<compile_context>
chip_gen: v5e
topology: v5e:2x2
jax: 0.10.0
libtpu: 0.0.40
codegen_flags: <defaults>
</compile_context>

<pallas_src>
import functools

import jax
import jax.numpy as jnp
from jax import lax
from jax.experimental import pallas as pl
from jax.experimental.pallas import tpu as pltpu


# ----------------------------- small helpers --------------------------------

def _round_up(a: int, b: int) -> int:
    return (a + b - 1) // b * b


def _cdiv(a: int, b: int) -> int:
    return -(-a // b)


def _chip_generation() -> int:
    """Best-effort TPU generation (5, 6, 7, ...); defaults to 6 if unknown."""
    try:
        kind = jax.devices()[0].device_kind.lower()
    except Exception:
        return 6
    for g in (7, 6, 5, 4):
        if f"v{g}" in kind:
            return g
    return 6


def _vmem_budget_bytes() -> int:
    # Physical VMEM per TensorCore: 128 MiB on v5e/v6e, 64 MiB on v7x.
    # Leave headroom for Mosaic-internal scratch so enlarged tiles never cause
    # an allocation failure.
    cap = (64 << 20) if _chip_generation() >= 7 else (128 << 20)
    return cap - (16 << 20)


def _pick_tile(extent: int, target: int, align: int) -> int:
    """Largest aligned tile <= target that minimizes padding of `extent`."""
    padded = _round_up(extent, align)
    if padded <= target:
        return padded
    n0 = _cdiv(padded, target)
    best_key, best_tile = None, None
    for n in range(n0, n0 + 4):                      # tiny search over tile counts
        tile = _round_up(_cdiv(padded, n), align)
        waste = _round_up(extent, tile) - extent     # padded work
        key = (waste, n)                             # prefer less waste, then fewer steps
        if best_key is None or key < best_key:
            best_key, best_tile = key, tile
    return best_tile


# ------------------------------- kernels -------------------------------------

def _combine_weights_kernel(scale_ref, wo_ref, wa_ref, w_ref):
    # One-shot elementwise combine: W = W_orig + scale * W_aux (f32 math, cast to
    # the matmul input dtype).  Runs once per forward; VPU cost is negligible.
    s = scale_ref[0, 0]
    w_ref[...] = (wo_ref[...].astype(jnp.float32)
                  + s * wa_ref[...].astype(jnp.float32)).astype(w_ref.dtype)


def _matmul_bias_kernel(x_ref, w_ref, b_ref, o_ref, *scratch):
    # y = x @ W.T + b with a pre-combined weight.  If no scratch is passed the
    # (f32) output block itself is the accumulator.
    acc_ref = scratch[0] if scratch else o_ref
    k = pl.program_id(2)

    @pl.when(k == 0)
    def _init():
        acc_ref[...] = jnp.zeros_like(acc_ref)

    # Contract K of (tm, tk) x against K of the (tn, tk) weight tile directly
    # (PyTorch (N, K) layout) -> no explicit transpose; accumulate in f32 on MXU.
    acc_ref[...] += lax.dot_general(
        x_ref[...], w_ref[...],
        dimension_numbers=(((1,), (1,)), ((), ())),
        preferred_element_type=jnp.float32)

    @pl.when(k == pl.num_programs(2) - 1)
    def _fin():
        o_ref[...] = (acc_ref[...] + b_ref[...].astype(jnp.float32)).astype(o_ref.dtype)


def _fused_matmul_kernel(scale_ref, x_ref, wo_ref, wa_ref, b_ref, o_ref, *scratch,
                         combine_dtype):
    # Decode / single-M-tile path: per-tile weight combine fused with the matmul
    # (weights are streamed exactly once, so pre-combining would add HBM traffic).
    acc_ref = scratch[0] if scratch else o_ref
    k = pl.program_id(2)

    @pl.when(k == 0)
    def _init():
        acc_ref[...] = jnp.zeros_like(acc_ref)

    s = scale_ref[0, 0]                                   # f32 scalar in SMEM
    # With bf16 inputs on v6e/v7x, combine_dtype == bf16: the add and the MXU feed
    # stay in packed bf16 vregs (only the scale multiply is f32, avoiding a scalar
    # bf16 path).  On v5e / f32 inputs combine_dtype == f32.
    wa_scaled = (wa_ref[...] * s).astype(combine_dtype)
    w = (wo_ref[...].astype(combine_dtype) + wa_scaled).astype(x_ref.dtype)

    acc_ref[...] += lax.dot_general(
        x_ref[...], w,
        dimension_numbers=(((1,), (1,)), ((), ())),
        preferred_element_type=jnp.float32)

    @pl.when(k == pl.num_programs(2) - 1)
    def _fin():
        o_ref[...] = (acc_ref[...] + b_ref[...].astype(jnp.float32)).astype(o_ref.dtype)


# ------------------------------- wrapper --------------------------------------

def cross_modal_reparam_linear(x, w_orig, w_aux, bias, scale,
                               *, tm=None, tn=None, tk=None):
    """y = x @ (W_orig + scale * W_aux).T + bias

    x: (..., K); w_orig, w_aux: (N, K); bias: (N,) or None; scale: scalar.
    """
    orig_shape = x.shape
    K = orig_shape[-1]
    N = w_orig.shape[0]
    x2d = x.reshape(-1, K)
    M = x2d.shape[0]
    out_dtype = x.dtype

    if bias is None:
        bias = jnp.zeros((N,), dtype=out_dtype)

    xb = jnp.dtype(x.dtype).itemsize
    wb = jnp.dtype(w_orig.dtype).itemsize
    ob = jnp.dtype(out_dtype).itemsize

    # Large default tiles (review): use VMEM, amortize grid-step overhead, cut
    # weight re-streaming.  bf16 gets a deeper K tile.
    if tm is None:
        tm = 512
    if tn is None:
        tn = 512
    if tk is None:
        tk = 2048 if xb <= 2 else 1024

    tm = _pick_tile(M, tm, 8)
    tn = _pick_tile(N, tn, 128)      # lane dim of the output -> multiple of 128
    tk = _pick_tile(K, tk, 128)

    # Guarantee >= 2 "parallel" output blocks so both v7x TensorCores get work
    # (and megacore sharding on older parts); split along M preferentially.
    if (_round_up(M, tm) // tm) * (_round_up(N, tn) // tn) < 2:
        if M >= 16:
            tm = _round_up(_cdiv(_round_up(M, 8), 2), 8)
        elif N >= 256:
            tn = _round_up(_cdiv(_round_up(N, 128), 2), 128)

    Mp, Np, Kp = _round_up(M, tm), _round_up(N, tn), _round_up(K, tk)
    grid_i = Mp // tm

    # Fused per-tile combine only when the weights are streamed a single time
    # (single M tile).  Otherwise hoist the combine into a one-shot kernel.
    fused = grid_i == 1
    direct_acc = jnp.dtype(out_dtype) == jnp.float32   # accumulate straight into o_ref

    def footprint(tm_, tn_, tk_):
        w_streams = 2 if fused else 1
        w_bytes = wb if fused else xb
        f = (2 * tm_ * tk_ * xb                 # x blocks (double-buffered)
             + 2 * w_streams * tn_ * tk_ * w_bytes
             + 2 * tn_ * 4                      # bias block (tiny)
             + 2 * tm_ * tn_ * ob)              # output blocks
        if not direct_acc:
            f += tm_ * tn_ * 4                  # f32 accumulator scratch
        return f

    budget = _vmem_budget_bytes()
    while footprint(tm, tn, tk) > budget and tk > 256:
        tk = _round_up(_cdiv(tk, 2), 128)
    while footprint(tm, tn, tk) > budget and tm > 64:
        tm = _round_up(_cdiv(tm, 2), 8)

    Mp, Np, Kp = _round_up(M, tm), _round_up(N, tn), _round_up(K, tk)
    grid = (Mp // tm, Np // tn, Kp // tk)
    vmem_limit = int(min(budget, max(footprint(tm, tn, tk) + (8 << 20), 32 << 20)))

    # Zero-pad (extra K columns contribute 0; extra M/N sliced off afterwards).
    xp = jnp.pad(x2d, ((0, Mp - M), (0, Kp - K)))
    wop = jnp.pad(w_orig, ((0, Np - N), (0, Kp - K)))
    wap = jnp.pad(w_aux, ((0, Np - N), (0, Kp - K)))
    bp = jnp.pad(bias, (0, Np - N)).reshape(1, Np)
    scale_arr = jnp.asarray(scale, jnp.float32).reshape(1, 1)

    scratch = [] if direct_acc else [pltpu.VMEM((tm, tn), jnp.float32)]
    mm_params = pltpu.CompilerParams(
        dimension_semantics=("parallel", "parallel", "arbitrary"),
        vmem_limit_bytes=vmem_limit)
    out_block = pl.BlockSpec((tm, tn), lambda i, j, k: (i, j))

    if fused:
        gen = _chip_generation()
        combine_dtype = (jnp.bfloat16
                         if (jnp.dtype(x.dtype) == jnp.bfloat16 and gen >= 6)
                         else jnp.float32)
        out = pl.pallas_call(
            functools.partial(_fused_matmul_kernel, combine_dtype=combine_dtype),
            out_shape=jax.ShapeDtypeStruct((Mp, Np), out_dtype),
            grid=grid,
            in_specs=[
                pl.BlockSpec(memory_space=pltpu.MemorySpace.SMEM),       # scale
                pl.BlockSpec((tm, tk), lambda i, j, k: (i, k)),          # x
                pl.BlockSpec((tn, tk), lambda i, j, k: (j, k)),          # W_orig
                pl.BlockSpec((tn, tk), lambda i, j, k: (j, k)),          # W_aux
                pl.BlockSpec((1, tn), lambda i, j, k: (0, j)),           # bias
            ],
            out_specs=out_block,
            scratch_shapes=scratch,
            compiler_params=mm_params,
            cost_estimate=pl.CostEstimate(
                flops=2 * M * N * K + 2 * N * K, transcendentals=0,
                bytes_accessed=M * K * xb + 2 * N * K * wb + M * N * ob),
        )(scale_arr, xp, wop, wap, bp)
    else:
        # One-shot combine: W = W_orig + scale * W_aux (stored in the matmul
        # input dtype), then a single-weight matmul.
        w_comb = pl.pallas_call(
            _combine_weights_kernel,
            out_shape=jax.ShapeDtypeStruct((Np, Kp), x.dtype),
            grid=(Np // tn, Kp // tk),
            in_specs=[
                pl.BlockSpec(memory_space=pltpu.MemorySpace.SMEM),       # scale
                pl.BlockSpec((tn, tk), lambda j, k: (j, k)),             # W_orig
                pl.BlockSpec((tn, tk), lambda j, k: (j, k)),             # W_aux
            ],
            out_specs=pl.BlockSpec((tn, tk), lambda j, k: (j, k)),
            compiler_params=pltpu.CompilerParams(
                dimension_semantics=("parallel", "parallel"),
                vmem_limit_bytes=vmem_limit),
        )(scale_arr, wop, wap)

        out = pl.pallas_call(
            _matmul_bias_kernel,
            out_shape=jax.ShapeDtypeStruct((Mp, Np), out_dtype),
            grid=grid,
            in_specs=[
                pl.BlockSpec((tm, tk), lambda i, j, k: (i, k)),          # x
                pl.BlockSpec((tn, tk), lambda i, j, k: (j, k)),          # W combined
                pl.BlockSpec((1, tn), lambda i, j, k: (0, j)),           # bias
            ],
            out_specs=out_block,
            scratch_shapes=scratch,
            compiler_params=mm_params,
            cost_estimate=pl.CostEstimate(
                flops=2 * M * N * K, transcendentals=0,
                bytes_accessed=M * K * xb + N * K * xb + M * N * ob),
        )(xp, w_comb, bp)

    return out[:M, :N].reshape(*orig_shape[:-1], N)


# --------------------------------- tests ---------------------------------------

if __name__ == "__main__":
    scale = jnp.float32(0.5)   # nn.Parameter(torch.zeros(1)) inits to 0; use nonzero
                               # so the auxiliary path actually contributes.

    # --- Test 1: small module-like shapes (f32). ---
    batch, seq, in_features, out_features = 2, 8, 32, 32
    k_x, k_wo, k_wa, k_b = jax.random.split(jax.random.PRNGKey(0), 4)
    x = jax.random.normal(k_x, (batch, seq, in_features), jnp.float32)
    w_orig = jax.random.normal(k_wo, (out_features, in_features), jnp.float32) * 0.1
    w_aux = jax.random.normal(k_wa, (out_features, in_features), jnp.float32) * 0.1
    bias = jax.random.normal(k_b, (out_features,), jnp.float32) * 0.1

    y = jax.block_until_ready(cross_modal_reparam_linear(x, w_orig, w_aux, bias, scale))
    y_ref = jnp.einsum("bsk,nk->bsn", x, w_orig + scale * w_aux) + bias
    assert y.shape == (batch, seq, out_features)
    assert jnp.allclose(y, y_ref, atol=1e-5, rtol=1e-5), "mismatch vs reference (small f32)"

    # --- Test 2: multi-tile f32 (pre-combined weight path + multi-step K reduction). ---
    b2, s2, k2, n2 = 2, 320, 2304, 384          # M = 640 spans 2 M-tiles, K -> 3 k-steps
    kk = jax.random.split(jax.random.PRNGKey(1), 4)
    x2 = jax.random.normal(kk[0], (b2, s2, k2), jnp.float32)
    wo2 = jax.random.normal(kk[1], (n2, k2), jnp.float32) * 0.05
    wa2 = jax.random.normal(kk[2], (n2, k2), jnp.float32) * 0.05
    bv2 = jax.random.normal(kk[3], (n2,), jnp.float32) * 0.1

    y2 = jax.block_until_ready(cross_modal_reparam_linear(x2, wo2, wa2, bv2, scale))
    y2_ref = jnp.einsum("bsk,nk->bsn", x2, wo2 + scale * wa2) + bv2
    assert y2.shape == (b2, s2, n2)
    assert jnp.allclose(y2, y2_ref, atol=1e-2, rtol=1e-2), "mismatch vs reference (tiled f32)"

    # --- Test 3: bf16 decode shape (fused per-tile combine, bf16 math on v6e/v7x). ---
    b3, s3, k3, n3 = 1, 8, 512, 256
    kb = jax.random.split(jax.random.PRNGKey(2), 4)
    x3 = jax.random.normal(kb[0], (b3, s3, k3), jnp.float32).astype(jnp.bfloat16)
    wo3 = (jax.random.normal(kb[1], (n3, k3), jnp.float32) * 0.05).astype(jnp.bfloat16)
    wa3 = (jax.random.normal(kb[2], (n3, k3), jnp.float32) * 0.05).astype(jnp.bfloat16)
    bv3 = (jax.random.normal(kb[3], (n3,), jnp.float32) * 0.1).astype(jnp.bfloat16)

    y3 = jax.block_until_ready(cross_modal_reparam_linear(x3, wo3, wa3, bv3, scale))
    w3_ref = wo3.astype(jnp.float32) + float(scale) * wa3.astype(jnp.float32)
    y3_ref = (jnp.einsum("bsk,nk->bsn", x3.astype(jnp.float32), w3_ref)
              + bv3.astype(jnp.float32))
    assert y3.shape == (b3, s3, n3)
    assert jnp.allclose(y3.astype(jnp.float32), y3_ref, atol=5e-2, rtol=5e-2), \
        "mismatch vs reference (bf16 decode)"

    print("KERNEL_OK")
</pallas_src>

<mosaic_0001>
module attributes {stable_mosaic.version = 11 : i64} {
  func.func @_combine_weights_kernel(%arg0: i32, %arg1: i32, %arg2: memref<1x1xf32, #tpu.memory_space<smem>>, %arg3: memref<128x128xf32, #tpu.memory_space<vmem>>, %arg4: memref<128x128xf32, #tpu.memory_space<vmem>>, %arg5: memref<128x128xf32, #tpu.memory_space<vmem>>) attributes {dimension_semantics = [#tpu.dimension_semantics<parallel>, #tpu.dimension_semantics<parallel>], iteration_bounds = array<i64: 1, 1>, scalar_prefetch = 0 : i64, scratch_operands = 0 : i64, tpu.core_type = #tpu.core_type<tc>, window_params = [{transform_indices = @transform_0, window_bounds = array<i64: 1, 1>}, {transform_indices = @transform_1, window_bounds = array<i64: 128, 128>}, {transform_indices = @transform_2, window_bounds = array<i64: 128, 128>}, {transform_indices = @transform_3, window_bounds = array<i64: 128, 128>}]} {
    %c0 = arith.constant 0 : index
    %c0_0 = arith.constant 0 : index
    %0 = memref.load %arg2[%c0, %c0_0] : memref<1x1xf32, #tpu.memory_space<smem>>
    %c0_1 = arith.constant 0 : index
    %c0_2 = arith.constant 0 : index
    %1 = vector.load %arg3[%c0_1, %c0_2] : memref<128x128xf32, #tpu.memory_space<vmem>>, vector<128x128xf32>
    %c0_3 = arith.constant 0 : index
    %c0_4 = arith.constant 0 : index
    %2 = vector.load %arg4[%c0_3, %c0_4] : memref<128x128xf32, #tpu.memory_space<vmem>>, vector<128x128xf32>
    %3 = vector.broadcast %0 : f32 to vector<128x128xf32>
    %4 = arith.mulf %3, %2 : vector<128x128xf32>
    %5 = arith.addf %1, %4 : vector<128x128xf32>
    %c0_5 = arith.constant 0 : index
    %c0_6 = arith.constant 0 : index
    %6 = vector.load %arg5[%c0_5, %c0_6] : memref<128x128xf32, #tpu.memory_space<vmem>>, vector<128x128xf32>
    tpu.vector_store %arg5[%c0_5, %c0_6], %5 {strides = array<i32>} : memref<128x128xf32, #tpu.memory_space<vmem>>, vector<128x128xf32>,
    return
  }
  func.func @transform_0(%arg0: i32, %arg1: i32) -> (i32, i32) {
    %c0_i32 = arith.constant 0 : i32
    %c0_i32_0 = arith.constant 0 : i32
    %c0_i32_1 = arith.constant 0 : i32
    return %c0_i32, %c0_i32_0 : i32, i32
  }
  func.func @transform_1(%arg0: i32, %arg1: i32) -> (i32, i32) {
    %c0_i32 = arith.constant 0 : i32
    return %arg0, %arg1 : i32, i32
  }
  func.func @transform_2(%arg0: i32, %arg1: i32) -> (i32, i32) {
    %c0_i32 = arith.constant 0 : i32
    return %arg0, %arg1 : i32, i32
  }
  func.func @transform_3(%arg0: i32, %arg1: i32) -> (i32, i32) {
    %c0_i32 = arith.constant 0 : i32
    return %arg0, %arg1 : i32, i32
  }
}

</mosaic_0001>

<bundles_post_ra>
// kernel: tpu_custom_call.1
= control target key start
LH: loop header
LB: loop body
LE: loop exit
PB: predicated region body
PF: predicated region fallthrough
CT: control target
= control target key end

     0   :  { %9 = vsyncpa [#allocation4], 0  ;;  %s297_s0 = inlined_call_operand.<no memory space> [shape: f32[1,1], index: 0, kind: input, shape index: {}]   ;;  %s298_s1 = inlined_call_operand.hbm [shape: f32[128,128], index: 1, kind: input, shape index: {}]   ;;  %s299_s2 = inlined_call_operand.hbm [shape: f32[128,128], index: 2, kind: input, shape index: {}]   ;;  %s300_s3 = inlined_call_operand.hbm [shape: f32[128,128], index: 3, kind: output, shape index: {}]  }
   0x1   :  { %10 = vsyncpa [#allocation7], 0 }
   0x2   :  { %11 = vsyncpa [#allocation5], 0  ;;  %s18_s14 = sshll.u32 %s298_s1, 4  ;;  %s233_s15 = smov [#allocation3]   ;;  %s19_s14 = int_to_ptr.hbm [resolvable:$true] %s18_s14 }
   0x3   :  { %s20_s16 = sshll.u32 %s233_s15, 4  ;;  %s31_s19 = sshll.u32 %s299_s2, 4  ;;  %s21_s16 = int_to_ptr.vmem [resolvable:$true] %s20_s16  ;;  %s32_s19 = int_to_ptr.hbm [resolvable:$true] %s31_s19 }
   0x4   :  { %s234_s20 = smov 128   ;;  %s235_s21 = smov 8  }
   0x5   :  { %26 = dma.hbm_to_vmem [thread:$0]  %s19_s14, 2048, %s21_s16, [#allocation4], %s234_s20, %s234_s20, %s235_s21  }
   0x6   :  { %s236_s22 = smov [#allocation6]  }
   0x7   :  { %s33_s23 = sshll.u32 %s236_s22, 4  ;;  %s34_s23 = int_to_ptr.vmem [resolvable:$true] %s33_s23 }
   0x8   :  { %39 = dma.hbm_to_vmem [thread:$0]  %s32_s19, 2048, %s34_s23, [#allocation7], %s234_s20, %s234_s20, %s235_s21  }
   0x9   :  { %227 = dma.done.wait [#allocation4], 2048  }
   0xa   :  { %228 = vsyncadd [#allocation4], 4294965248 }
   0xb   :  { %229 = dma.done.wait [#allocation7], 2048  }
   0xc   :  { %230 = vsyncadd [#allocation7], 4294965248  ;;  %v273_v0 = vstv %s297_s0  ;;  %v49_v1 = vld [vmem:[#allocation3] sm:$0xff]  ;;  %v50_v3 = vld [vmem:[#allocation3 + $0x8] sm:$0xff]  ;;  %s237_s0 = smov [#allocation8]   ;;  %s136_s27 = sshll.u32 %s300_s3, 4  ;;  %s137_s27 = int_to_ptr.hbm [resolvable:$true] %s136_s27 }
   0xd   :  { %v65_v2 = vld [vmem:[#allocation6] sm:$0xff]  ;;  %v66_v5 = vld [vmem:[#allocation6 + $0x8] sm:$0xff]  ;;  %v51_v6 = vld [vmem:[#allocation3 + $0x10] sm:$0xff]  ;;  %s134_s24 = sshll.u32 %s237_s0, 4  ;;  %s135_s24 = int_to_ptr.vmem [resolvable:$true] %s134_s24 }
   0xe   :  { %v82_v4 = vmul.f32 %v273_v0, %v65_v2  ;;  %v67_v7 = vld [vmem:[#allocation6 + $0x10] sm:$0xff]  ;;  %v83_v8 = vmul.f32 %v273_v0, %v66_v5  ;;  %v52_v10 = vld [vmem:[#allocation3 + $0x18] sm:$0xff]  ;;  %v53_v12 = vld [vmem:[#allocation3 + $0x20] sm:$0xff] }
   0xf   :  { %v84_v9 = vmul.f32 %v273_v0, %v67_v7  ;;  %v68_v11 = vld [vmem:[#allocation6 + $0x18] sm:$0xff]  ;;  %v69_v15 = vld [vmem:[#allocation6 + $0x20] sm:$0xff]  ;;  %v54_v16 = vld [vmem:[#allocation3 + $0x28] sm:$0xff] }
  0x10   :  { %v98_v13 = vadd.f32 %v82_v4, %v49_v1  ;;  %v85_v14 = vmul.f32 %v273_v0, %v68_v11  ;;  %v70_v17 = vld [vmem:[#allocation6 + $0x28] sm:$0xff]  ;;  %v99_v18 = vadd.f32 %v83_v8, %v50_v3  ;;  %v86_v20 = vmul.f32 %v273_v0, %v69_v15  ;;  %v55_v22 = vld [vmem:[#allocation3 + $0x30] sm:$0xff]  ;;  %v56_v26 = vld [vmem:[#allocation3 + $0x38] sm:$0xff] }
  0x11   :  { %v100_v19 = vadd.f32 %v84_v9, %v51_v6  ;;  %v87_v21 = vmul.f32 %v273_v0, %v70_v17  ;;  %v71_v23 = vld [vmem:[#allocation6 + $0x30] sm:$0xff]  ;;  %v72_v27 = vld [vmem:[#allocation6 + $0x38] sm:$0xff]  ;;  %v73_v28 = vld [vmem:[#allocation6 + $0x40] sm:$0xff] }
  0x12   :  { %114 = vst [vmem:[#allocation8] sm:$0xff] %v98_v13  ;;  %v101_v24 = vadd.f32 %v85_v14, %v52_v10  ;;  %v88_v25 = vmul.f32 %v273_v0, %v71_v23  ;;  %v102_v29 = vadd.f32 %v86_v20, %v53_v12  ;;  %v89_v31 = vmul.f32 %v273_v0, %v72_v27  ;;  %v57_v32 = vld [vmem:[#allocation3 + $0x40] sm:$0xff]  ;;  %v74_v34 = vld [vmem:[#allocation6 + $0x48] sm:$0xff]  ;;  %v75_v38 = vld [vmem:[#allocation6 + $0x50] sm:$0xff] }
  0x13   :  { %115 = vst [vmem:[#allocation8 + $0x8] sm:$0xff] %v99_v18  ;;  %v103_v30 = vadd.f32 %v87_v21, %v54_v16  ;;  %v90_v33 = vmul.f32 %v273_v0, %v73_v28  ;;  %v58_v36 = vld [vmem:[#allocation3 + $0x48] sm:$0xff]  ;;  %v91_v37 = vmul.f32 %v273_v0, %v74_v34  ;;  %v76_v39 = vld [vmem:[#allocation6 + $0x58] sm:$0xff]  ;;  %v59_v41 = vld [vmem:[#allocation3 + $0x50] sm:$0xff]  ;;  %v92_v42 = vmul.f32 %v273_v0, %v75_v38 }
  0x14   :  { %116 = vst [vmem:[#allocation8 + $0x10] sm:$0xff] %v100_v19  ;;  %v104_v35 = vadd.f32 %v88_v25, %v55_v22  ;;  %v105_v40 = vadd.f32 %v89_v31, %v56_v26  ;;  %v93_v43 = vmul.f32 %v273_v0, %v76_v39  ;;  %v77_v44 = vld [vmem:[#allocation6 + $0x60] sm:$0xff]  ;;  %v60_v46 = vld [vmem:[#allocation3 + $0x58] sm:$0xff]  ;;  %v78_v48 = vld [vmem:[#allocation6 + $0x68] sm:$0xff] }
  0x15   :  { %117 = vst [vmem:[#allocation8 + $0x18] sm:$0xff] %v101_v24  ;;  %v106_v45 = vadd.f32 %v90_v33, %v57_v32  ;;  %v94_v47 = vmul.f32 %v273_v0, %v77_v44  ;;  %v79_v49 = vld [vmem:[#allocation6 + $0x70] sm:$0xff]  ;;  %v107_v50 = vadd.f32 %v91_v37, %v58_v36  ;;  %v61_v51 = vld [vmem:[#allocation3 + $0x60] sm:$0xff]  ;;  %v95_v52 = vmul.f32 %v273_v0, %v78_v48  ;;  %v80_v53 = vld [vmem:[#allocation6 + $0x78] sm:$0xff] }
  0x16   :  { %118 = vst [vmem:[#allocation8 + $0x20] sm:$0xff] %v102_v29  ;;  %v108_v54 = vadd.f32 %v92_v42, %v59_v41  ;;  %v62_v55 = vld [vmem:[#allocation3 + $0x68] sm:$0xff]  ;;  %v96_v56 = vmul.f32 %v273_v0, %v79_v49  ;;  %v109_v57 = vadd.f32 %v93_v43, %v60_v46  ;;  %v63_v58 = vld [vmem:[#allocation3 + $0x70] sm:$0xff]  ;;  %v97_v59 = vmul.f32 %v273_v0, %v80_v53  ;;  %v64_v61 = vld [vmem:[#allocation3 + $0x78] sm:$0xff] }
  0x17   :  { %119 = vst [vmem:[#allocation8 + $0x28] sm:$0xff] %v103_v30  ;;  %v110_v60 = vadd.f32 %v94_v47, %v61_v51  ;;  %v111_v62 = vadd.f32 %v95_v52, %v62_v55 }
  0x18   :  { %120 = vst [vmem:[#allocation8 + $0x30] sm:$0xff] %v104_v35  ;;  %v112_v63 = vadd.f32 %v96_v56, %v63_v58  ;;  %v113_v1 = vadd.f32 %v97_v59, %v64_v61 }
  0x19   :  { %121 = vst [vmem:[#allocation8 + $0x38] sm:$0xff] %v105_v40 }
  0x1a   :  { %122 = vst [vmem:[#allocation8 + $0x40] sm:$0xff] %v106_v45 }
  0x1b   :  { %123 = vst [vmem:[#allocation8 + $0x48] sm:$0xff] %v107_v50 }
  0x1c   :  { %124 = vst [vmem:[#allocation8 + $0x50] sm:$0xff] %v108_v54 }
  0x1d   :  { %125 = vst [vmem:[#allocation8 + $0x58] sm:$0xff] %v109_v57 }
  0x1e   :  { %126 = vst [vmem:[#allocation8 + $0x60] sm:$0xff] %v110_v60 }
  0x1f   :  { %127 = vst [vmem:[#allocation8 + $0x68] sm:$0xff] %v111_v62 }
  0x20   :  { %128 = vst [vmem:[#allocation8 + $0x70] sm:$0xff] %v112_v63 }
  0x21   :  { %129 = vst [vmem:[#allocation8 + $0x78] sm:$0xff] %v113_v1 }
  0x22   :  { %142 = dma.vmem_to_hbm [thread:$0]  %s135_s24, 2048, %s137_s27, [#allocation5], %s234_s20, %s234_s20, %s235_s21  }
  0x23   :  { %231 = dma.done.wait [#allocation5], 2048  }
  0x24   :  { %232 = vsyncadd [#allocation5], 4294965248 }
  0x25   :  { %147 = vsyncpa [#allocation4], 1 }
  0x26   :  { %148 = vsyncpa [#allocation7], 1 }
  0x27   :  { %149 = vsyncpa [#allocation5], 1 }

</bundles_post_ra>
